<compile_context>
chip_gen: v5e
topology: v5e:2x2
jax: 0.10.0
libtpu: 0.0.40
codegen_flags: <defaults>
</compile_context>

<pallas_src>
from functools import partial

import jax
import jax.numpy as jnp
from jax.experimental import pallas as pl
from jax.experimental.pallas import tpu as pltpu

N_INPUT = 13
N_HIDDEN = 32
N_OUT = 3

LANE = 128              # batch tiles are lane-aligned
MAX_BATCH_TILE = 16384  # multiple of 128; ~8 MiB x-block in VMEM at f32
MIN_GRID = 2            # keep >=2 grid steps when possible (v7x dual-TC, pipelining)
VMEM_LIMIT_BYTES = 48 * 1024 * 1024  # explicit scoped-VMEM budget (fits v7x's 64 MiB)


def _make_kernel(want_logits: bool, want_probs: bool):
    """Kernel factory: emit only the outputs that are actually requested."""

    def kernel(x_ref, w1_ref, b1_ref, w2_ref, b2_ref, *out_refs):
        # x_ref : (tb, 13) f32   batch-major input tile
        # w1_ref: (13, 32) f32   (fc1 weight, pre-transposed)   b1_ref: (1, 32) f32
        # w2_ref: (3, 32)  f32   (fc2 weight, torch layout)     b2_ref: (3, 1)  f32
        x = x_ref[...]

        # fc1 batch-major on the MXU: (tb, 13) @ (13, 32) -> (tb, 32), f32 acc.
        h = jnp.dot(x, w1_ref[...], preferred_element_type=jnp.float32) + b1_ref[...]

        # Sigmoid in f32: exp on the EUP, exact divide (kernel is HBM-bound).
        h = 1.0 / (1.0 + jnp.exp(-h))

        # Transpose only the small hidden activation on the XLU so fc2 emits
        # lane-dense, feature-major logits: (32, tb).
        h_t = h.T

        # fc2: (3, 32) @ (32, tb) -> (3, tb) logits.
        logits = jnp.dot(w2_ref[...], h_t,
                         preferred_element_type=jnp.float32) + b2_ref[...]

        idx = 0
        if want_logits:
            out_refs[idx][...] = logits
            idx += 1
        if want_probs:
            # Fused softmax over the class (sublane) axis; exact normalization.
            m = jnp.max(logits, axis=0, keepdims=True)
            e = jnp.exp(logits - m)
            out_refs[idx][...] = e / jnp.sum(e, axis=0, keepdims=True)

    return kernel


def _pick_tile(batch):
    """Lane-aligned batch tile; a few big grid steps instead of many tiny ones."""
    padded = LANE * pl.cdiv(batch, LANE)
    n_steps = max(pl.cdiv(padded, MAX_BATCH_TILE), MIN_GRID)
    tb = LANE * pl.cdiv(padded, n_steps * LANE)
    tb = min(tb, padded)
    padded = tb * pl.cdiv(padded, tb)
    return tb, padded


@partial(jax.jit, static_argnames=("want_logits", "want_probs"))
def _wine_call(x, w1, b1, w2, b2, *, want_logits=True, want_probs=True):
    """x: (B, N_INPUT) f32; torch-layout params w: (out, in), b: (out,).

    Returns a tuple of the requested outputs, each (B, N_OUT) f32.
    """
    batch = x.shape[0]
    tb, padded = _pick_tile(batch)

    # Pad the batch only when necessary (pure zero-fill; no transpose).
    if padded != batch:
        x_p = jnp.zeros((padded, N_INPUT), x.dtype).at[:batch].set(x)
    else:
        x_p = x

    n_out = int(want_logits) + int(want_probs)
    out_shape = tuple(jax.ShapeDtypeStruct((N_OUT, padded), jnp.float32)
                      for _ in range(n_out))
    out_specs = tuple(pl.BlockSpec((N_OUT, tb), lambda i: (0, i))
                      for _ in range(n_out))

    cost = pl.CostEstimate(
        flops=2 * padded * (N_INPUT * N_HIDDEN + N_HIDDEN * N_OUT),
        transcendentals=padded * (N_HIDDEN + (N_OUT if want_probs else 0)),
        bytes_accessed=padded * (4 * N_INPUT + 4 * N_OUT * n_out),
    )

    outs = pl.pallas_call(
        _make_kernel(want_logits, want_probs),
        out_shape=out_shape,
        grid=(padded // tb,),
        in_specs=[
            pl.BlockSpec((tb, N_INPUT), lambda i: (i, 0)),          # x tile
            pl.BlockSpec((N_INPUT, N_HIDDEN), lambda i: (0, 0)),    # w1^T (VMEM-resident)
            pl.BlockSpec((1, N_HIDDEN), lambda i: (0, 0)),          # b1
            pl.BlockSpec((N_OUT, N_HIDDEN), lambda i: (0, 0)),      # w2
            pl.BlockSpec((N_OUT, 1), lambda i: (0, 0)),             # b2
        ],
        out_specs=out_specs,
        compiler_params=pltpu.CompilerParams(
            dimension_semantics=("parallel",),
            vmem_limit_bytes=VMEM_LIMIT_BYTES,
        ),
        cost_estimate=cost,
    )(
        x_p,
        w1.T.astype(jnp.float32),
        b1.reshape(1, N_HIDDEN).astype(jnp.float32),
        w2.astype(jnp.float32),
        b2.reshape(N_OUT, 1).astype(jnp.float32),
    )

    # Slice the valid batch BEFORE transposing back to torch (B, 3) layout,
    # so pad columns never take an extra HBM round trip.
    return tuple(o[:, :batch].T for o in outs)


def wine_forward(x, w1, b1, w2, b2):
    """Equivalent of WineNet.forward: logits (B, 3)."""
    return _wine_call(x, w1, b1, w2, b2, want_logits=True, want_probs=False)[0]


def wine_inference(x, w1, b1, w2, b2):
    """Equivalent of WineNet.inference: softmax probs (B, 3)."""
    return _wine_call(x, w1, b1, w2, b2, want_logits=False, want_probs=True)[0]


def wine_apply(x, w1, b1, w2, b2):
    """Both logits and probs in one fused call."""
    return _wine_call(x, w1, b1, w2, b2, want_logits=True, want_probs=True)


def init_params(key):
    """Torch-style layout and U(-1/sqrt(fan_in), 1/sqrt(fan_in)) init."""
    k1, k2, k3, k4 = jax.random.split(key, 4)
    bound1 = 1.0 / jnp.sqrt(jnp.float32(N_INPUT))
    bound2 = 1.0 / jnp.sqrt(jnp.float32(N_HIDDEN))
    w1 = jax.random.uniform(k1, (N_HIDDEN, N_INPUT), jnp.float32, -bound1, bound1)
    b1 = jax.random.uniform(k2, (N_HIDDEN,), jnp.float32, -bound1, bound1)
    w2 = jax.random.uniform(k3, (N_OUT, N_HIDDEN), jnp.float32, -bound2, bound2)
    b2 = jax.random.uniform(k4, (N_OUT,), jnp.float32, -bound2, bound2)
    return w1, b1, w2, b2


def reference_forward(x, w1, b1, w2, b2):
    h = jax.nn.sigmoid(x @ w1.T + b1)
    return h @ w2.T + b2


if __name__ == "__main__":
    key = jax.random.PRNGKey(0)
    kx, kp = jax.random.split(key)
    batch = 8
    x = jax.random.normal(kx, (batch, N_INPUT), jnp.float32)
    w1, b1, w2, b2 = init_params(kp)

    # Single-output fast paths (what forward()/inference() compile to).
    logits = wine_forward(x, w1, b1, w2, b2)
    probs = wine_inference(x, w1, b1, w2, b2)
    # Fused dual-output path.
    logits2, probs2 = wine_apply(x, w1, b1, w2, b2)
    jax.block_until_ready((logits, probs, logits2, probs2))

    ref_logits = reference_forward(x, w1, b1, w2, b2)
    ref_probs = jax.nn.softmax(ref_logits, axis=1)

    assert logits.shape == (batch, N_OUT)
    assert probs.shape == (batch, N_OUT)
    assert jnp.allclose(logits, ref_logits, atol=2e-3, rtol=2e-3)
    assert jnp.allclose(probs, ref_probs, atol=2e-3, rtol=2e-3)
    assert jnp.allclose(logits2, ref_logits, atol=2e-3, rtol=2e-3)
    assert jnp.allclose(probs2, ref_probs, atol=2e-3, rtol=2e-3)
    # Exact softmax normalization -> sums to 1 within f32 rounding.
    assert bool(jnp.all(jnp.abs(jnp.sum(probs, axis=1) - 1.0) < 1e-3))

    print("KERNEL_OK")
</pallas_src>

<mosaic_0001>
module attributes {stable_mosaic.version = 11 : i64} {
  func.func @kernel(%arg0: i32, %arg1: memref<128x13xf32, #tpu.memory_space<vmem>>, %arg2: memref<13x32xf32, #tpu.memory_space<vmem>>, %arg3: memref<1x32xf32, #tpu.memory_space<vmem>>, %arg4: memref<3x32xf32, #tpu.memory_space<vmem>>, %arg5: memref<3x1xf32, #tpu.memory_space<vmem>>, %arg6: memref<3x128xf32, #tpu.memory_space<vmem>>) attributes {dimension_semantics = [#tpu.dimension_semantics<parallel>], iteration_bounds = array<i64: 1>, scalar_prefetch = 0 : i64, scratch_operands = 0 : i64, tpu.core_type = #tpu.core_type<tc>, window_params = [{transform_indices = @transform_0, window_bounds = array<i64: 128, 13>}, {pipeline_mode = #tpu.pipeline_mode<synchronous>, transform_indices = @transform_1, window_bounds = array<i64: 13, 32>}, {pipeline_mode = #tpu.pipeline_mode<synchronous>, transform_indices = @transform_2, window_bounds = array<i64: 1, 32>}, {pipeline_mode = #tpu.pipeline_mode<synchronous>, transform_indices = @transform_3, window_bounds = array<i64: 3, 32>}, {pipeline_mode = #tpu.pipeline_mode<synchronous>, transform_indices = @transform_4, window_bounds = array<i64: 3, 1>}, {transform_indices = @transform_5, window_bounds = array<i64: 3, 128>}]} {
    %c0 = arith.constant 0 : index
    %c0_0 = arith.constant 0 : index
    %0 = vector.load %arg1[%c0, %c0_0] : memref<128x13xf32, #tpu.memory_space<vmem>>, vector<128x13xf32>
    %c0_1 = arith.constant 0 : index
    %c0_2 = arith.constant 0 : index
    %1 = vector.load %arg2[%c0_1, %c0_2] : memref<13x32xf32, #tpu.memory_space<vmem>>, vector<13x32xf32>
    %cst = arith.constant dense<0.000000e+00> : vector<128x32xf32>
    %2 = tpu.matmul %0, %1, %cst {dimension_numbers = #tpu.dot_dimension_numbers<[1], [0], [0], [1], [0, 0, 1, 1], [], []>} : vector<128x13xf32>, vector<13x32xf32>, vector<128x32xf32> -> vector<128x32xf32>
    %c0_3 = arith.constant 0 : index
    %c0_4 = arith.constant 0 : index
    %3 = vector.load %arg3[%c0_3, %c0_4] : memref<1x32xf32, #tpu.memory_space<vmem>>, vector<1x32xf32>
    %4 = vector.broadcast %3 : vector<1x32xf32> to vector<128x32xf32>
    %5 = arith.addf %2, %4 : vector<128x32xf32>
    %cst_5 = arith.constant 0.000000e+00 : f32
    %6 = vector.broadcast %cst_5 : f32 to vector<128x32xf32>
    %7 = arith.subf %6, %5 : vector<128x32xf32>
    %8 = math.exp %7 : vector<128x32xf32>
    %cst_6 = arith.constant 1.000000e+00 : f32
    %9 = vector.broadcast %cst_6 : f32 to vector<128x32xf32>
    %10 = arith.addf %9, %8 : vector<128x32xf32>
    %cst_7 = arith.constant 1.000000e+00 : f32
    %11 = vector.broadcast %cst_7 : f32 to vector<128x32xf32>
    %12 = arith.divf %11, %10 : vector<128x32xf32>
    %13 = tpu.transpose %12, [1, 0] : vector<128x32xf32> -> vector<32x128xf32>
    %c0_8 = arith.constant 0 : index
    %c0_9 = arith.constant 0 : index
    %14 = vector.load %arg4[%c0_8, %c0_9] : memref<3x32xf32, #tpu.memory_space<vmem>>, vector<3x32xf32>
    %cst_10 = arith.constant dense<0.000000e+00> : vector<3x128xf32>
    %15 = tpu.matmul %14, %13, %cst_10 {dimension_numbers = #tpu.dot_dimension_numbers<[1], [0], [0], [1], [0, 0, 1, 1], [], []>} : vector<3x32xf32>, vector<32x128xf32>, vector<3x128xf32> -> vector<3x128xf32>
    %c0_11 = arith.constant 0 : index
    %c0_12 = arith.constant 0 : index
    %16 = vector.load %arg5[%c0_11, %c0_12] : memref<3x1xf32, #tpu.memory_space<vmem>>, vector<3x1xf32>
    %17 = vector.broadcast %16 : vector<3x1xf32> to vector<3x128xf32>
    %18 = arith.addf %15, %17 : vector<3x128xf32>
    %c0_13 = arith.constant 0 : index
    %c0_14 = arith.constant 0 : index
    %19 = vector.load %arg6[%c0_13, %c0_14] : memref<3x128xf32, #tpu.memory_space<vmem>>, vector<3x128xf32>
    tpu.vector_store %arg6[%c0_13, %c0_14], %18 {strides = array<i32>} : memref<3x128xf32, #tpu.memory_space<vmem>>, vector<3x128xf32>,
    return
  }
  func.func @transform_0(%arg0: i32) -> (i32, i32) {
    %c0_i32 = arith.constant 0 : i32
    %c0_i32_0 = arith.constant 0 : i32
    return %arg0, %c0_i32 : i32, i32
  }
  func.func @transform_1(%arg0: i32) -> (i32, i32) {
    %c0_i32 = arith.constant 0 : i32
    %c0_i32_0 = arith.constant 0 : i32
    %c0_i32_1 = arith.constant 0 : i32
    return %c0_i32, %c0_i32_0 : i32, i32
  }
  func.func @transform_2(%arg0: i32) -> (i32, i32) {
    %c0_i32 = arith.constant 0 : i32
    %c0_i32_0 = arith.constant 0 : i32
    %c0_i32_1 = arith.constant 0 : i32
    return %c0_i32, %c0_i32_0 : i32, i32
  }
  func.func @transform_3(%arg0: i32) -> (i32, i32) {
    %c0_i32 = arith.constant 0 : i32
    %c0_i32_0 = arith.constant 0 : i32
    %c0_i32_1 = arith.constant 0 : i32
    return %c0_i32, %c0_i32_0 : i32, i32
  }
  func.func @transform_4(%arg0: i32) -> (i32, i32) {
    %c0_i32 = arith.constant 0 : i32
    %c0_i32_0 = arith.constant 0 : i32
    %c0_i32_1 = arith.constant 0 : i32
    return %c0_i32, %c0_i32_0 : i32, i32
  }
  func.func @transform_5(%arg0: i32) -> (i32, i32) {
    %c0_i32 = arith.constant 0 : i32
    %c0_i32_0 = arith.constant 0 : i32
    return %c0_i32, %arg0 : i32, i32
  }
}

</mosaic_0001>

<bundles_post_ra>
// kernel: _wine_call.1
= control target key start
LH: loop header
LB: loop body
LE: loop exit
PB: predicated region body
PF: predicated region fallthrough
CT: control target
= control target key end

     0   :  { %vm91_vm0 = vcmask 1044480   ;;  %vm42_vm1 = vcmask 105472   ;;  %vm471_vm8 = vcmask 261120   ;;  %s1110_s1 = inlined_call_operand.vmem [shape: f32[13,32], index: 1, kind: input, shape index: {}]   ;;  %s1111_s0 = inlined_call_operand.vmem [shape: f32[128,13], index: 0, kind: input, shape index: {}]   ;;  %s1112_s2 = inlined_call_operand.vmem [shape: f32[1,32], index: 2, kind: input, shape index: {}]   ;;  %s1113_s4 = inlined_call_operand.vmem [shape: f32[3,1], index: 4, kind: input, shape index: {}]   ;;  %s1114_s3 = inlined_call_operand.vmem [shape: f32[3,32], index: 3, kind: input, shape index: {}]   ;;  %s1115_s5 = inlined_call_operand.vmem [shape: f32[3,128], index: 5, kind: output, shape index: {}]  }
   0x1   :  { %v37_v0 = vld [vmem:[%s1110_s1 + $0x8] sm:$0x1f]  ;;  %v36_v1 = vld [vmem:[%s1110_s1] sm:$0xff]  ;;  %v26_v2 = vld [vmem:[%s1111_s0 + $0x30] sm:$0xff] }
   0x2   :  { %582 = vmatpush.msk.msra.mxu2 %vm91_vm0, %v37_v0  ;;  %583 = vmatpush.msk.msra.mxu3 %vm91_vm0, %v37_v0  ;;  %v33_v3 = vld [vmem:[%s1111_s0 + $0x68] sm:$0xff]  ;;  %v20_v4 = vld [vmem:[%s1111_s0] sm:$0xff]  ;;  %v27_v5 = vld [vmem:[%s1111_s0 + $0x38] sm:$0xff] }
   0x3   :  { %548 = vmatpush.msk.msra.mxu0 %vm91_vm0, %v37_v0  ;;  %v34_v6 = vld [vmem:[%s1111_s0 + $0x70] sm:$0xff]  ;;  %v21_v7 = vld [vmem:[%s1111_s0 + $0x8] sm:$0xff]  ;;  %v28_v8 = vld [vmem:[%s1111_s0 + $0x40] sm:$0xff] }
   0x4   :  { %584 = vmatpush.msra.mxu2 %v36_v1  ;;  %585 = vmatpush.msra.mxu3 %v36_v1  ;;  %v35_v9 = vld [vmem:[%s1111_s0 + $0x78] sm:$0xff]  ;;  %v22_v10 = vld [vmem:[%s1111_s0 + $0x10] sm:$0xff]  ;;  %v29_v11 = vld [vmem:[%s1111_s0 + $0x48] sm:$0xff] }
   0x5   :  { %555 = vmatmul.msk.f32.vlgmr.msra.gmra.mxu2 %vm42_vm1, %v26_v2  ;;  %562 = vmatmul.msk.f32.vlgmr.msra.gmra.mxu3 %vm42_vm1, %v33_v3  ;;  %v23_v12 = vld [vmem:[%s1111_s0 + $0x18] sm:$0xff]  ;;  %v30_v13 = vld [vmem:[%s1111_s0 + $0x50] sm:$0xff]  ;;  %v24_v14 = vld [vmem:[%s1111_s0 + $0x20] sm:$0xff] }
   0x6   :  { %110 = vmatpush.msra.mxu0 %v36_v1  ;;  %v31_v15 = vld [vmem:[%s1111_s0 + $0x58] sm:$0xff]  ;;  %v25_v16 = vld [vmem:[%s1111_s0 + $0x28] sm:$0xff]  ;;  %v32_v17 = vld [vmem:[%s1111_s0 + $0x60] sm:$0xff] }
   0x7   :  { %549 = vmatmul.msk.f32.vlgmr.msra.gmra.mxu0 %vm42_vm1, %v20_v4  ;;  %v757_v18 = vld [vmem:[%s1112_s2] ss:$0 sm:$0xff] }
   0xd   :  { %556 = vmatmul.msk.f32.gmra.mxu2 %vm42_vm1, %v27_v5  ;;  %563 = vmatmul.msk.f32.gmra.mxu3 %vm42_vm1, %v34_v6 }
   0xf   :  { %550 = vmatmul.msk.f32.gmra.mxu0 %vm42_vm1, %v21_v7 }
  0x15   :  { %557 = vmatmul.msk.f32.gmra.mxu2 %vm42_vm1, %v28_v8  ;;  %564 = vmatmul.msk.f32.gmra.mxu3 %vm42_vm1, %v35_v9 }
  0x17   :  { %551 = vmatmul.msk.f32.gmra.mxu0 %vm42_vm1, %v22_v10 }
  0x1d   :  { %558 = vmatmul.msk.f32.gmra.mxu2 %vm42_vm1, %v29_v11 }
  0x1f   :  { %552 = vmatmul.msk.f32.gmra.mxu0 %vm42_vm1, %v23_v12 }
  0x25   :  { %559 = vmatmul.msk.f32.gmra.mxu2 %vm42_vm1, %v30_v13 }
  0x27   :  { %553 = vmatmul.msk.f32.gmra.mxu0 %vm42_vm1, %v24_v14 }
  0x2d   :  { %560 = vmatmul.msk.f32.gmra.mxu2 %vm42_vm1, %v31_v15 }
  0x2f   :  { %554 = vmatmul.msk.f32.gmra.mxu0 %vm42_vm1, %v25_v16 }
  0x35   :  { %561 = vmatmul.msk.f32.gmra.mxu2 %vm42_vm1, %v32_v17 }
  0x84   :  { %v762_v22 = vpop.f32.mrf.mxu0 }
  0x88   :  { %v130_v19 = vpop.f32.mrf.mxu2  ;;  %v151_v20 = vpop.f32.mrf.mxu3 }
  0x89   :  { %v760_v21 = vadd.f32 %v757_v18, %v130_v19  ;;  %v152_v23 = vadd.f32 %v757_v18, %v151_v20 }
  0x8b   :  { %v173_v24 = vsub.f32 0.0, %v152_v23 }
  0x8c   :  { %v766_v30 = vpop.f32.mrf.mxu0 }
  0x8d   :  { %v202_v28 = vmul.f32 1.442695, %v173_v24 }
  0x8f   :  { %589 = vpow2.f32 %v202_v28 }
  0x90   :  { %v133_v25 = vpop.f32.mrf.mxu2  ;;  %v154_v26 = vpop.f32.mrf.mxu3 }
  0x91   :  { %v155_v27 = vadd.f32 %v757_v18, %v154_v26  ;;  %v134_v56 = vadd.f32 %v757_v18, %v133_v25 }
  0x93   :  { %v174_v29 = vsub.f32 0.0, %v155_v27  ;;  %v167_v6 = vsub.f32 0.0, %v134_v56 }
  0x94   :  { %v769_v38 = vpop.f32.mrf.mxu0 }
  0x95   :  { %v204_v31 = vmul.f32 1.442695, %v174_v29  ;;  %v590_v36 = vpop.eup %589  ;;  %v190_v19 = vmul.f32 1.442695, %v167_v6 }
  0x96   :  { %v771_v40 = vadd.f32 1.0, %v590_v36  ;;  %v166_v36 = vsub.f32 0.0, %v760_v21 }
  0x97   :  { %591 = vpow2.f32 %v204_v31 }
  0x98   :  { %v136_v32 = vpop.f32.mrf.mxu2  ;;  %v157_v33 = vpop.f32.mrf.mxu3  ;;  %vm424_vm10 = vweird.f32 %v771_v40  ;;  %v428_v24 = vand.u32 2147483647, %v771_v40  ;;  %v430_v31 = vand.u32 2147483648, %v771_v40 }
  0x99   :  { %v158_v34 = vadd.f32 %v757_v18, %v157_v33  ;;  %v137_v57 = vadd.f32 %v757_v18, %v136_v32 }
  0x9a   :  { %vm429_vm14 = vcmp.eq.f32.partialorder %v428_v24, 8.507059e+37 }
  0x9b   :  { %v175_v35 = vsub.f32 0.0, %v158_v34  ;;  %v168_v7 = vsub.f32 0.0, %v137_v57 }
  0x9c   :  { %v777_v46 = vpop.f32.mrf.mxu0 }
  0x9d   :  { %v206_v37 = vmul.f32 1.442695, %v175_v35  ;;  %v592_v39 = vpop.eup %591  ;;  %v192_v25 = vmul.f32 1.442695, %v168_v7 }
  0x9e   :  { %v773_v42 = vadd.f32 1.0, %v592_v39 }
  0x9f   :  { %593 = vpow2.f32 %v206_v37 }
  0xa0   :  { %v139_v41 = vpop.f32.mrf.mxu2  ;;  %595 = vrcp.f32 %v773_v42  ;;  %vm439_vm4 = vweird.f32 %v773_v42  ;;  %v443_v8 = vand.u32 2147483647, %v773_v42  ;;  %v445_v11 = vand.u32 2147483648, %v773_v42 }
  0xa1   :  { %597 = vrcp.f32 %v771_v40  ;;  %v140_v51 = vadd.f32 %v757_v18, %v139_v41 }
  0xa2   :  { %v446_v29 = vor.u32 1.1754944e-38, %v445_v11  ;;  %vm444_vm12 = vcmp.eq.f32.partialorder %v443_v8, 8.507059e+37 }
  0xa3   :  { %v169_v59 = vsub.f32 0.0, %v140_v51 }
  0xa4   :  { %v792_v2 = vpop.f32.mrf.mxu0 }
  0xa5   :  { %v594_v43 = vpop.eup %593  ;;  %v194_v12 = vmul.f32 1.442695, %v169_v59  ;;  %v122_v59 = vadd.f32 %v757_v18, %v777_v46  ;;  %v113_v46 = vadd.f32 %v757_v18, %v762_v22 }
  0xa6   :  { %v223_v44 = vadd.f32 1.0, %v594_v43  ;;  %v779_v47 = vpop.eup %595 }
  0xa7   :  { %v781_v48 = vpop.eup %597  ;;  %v435_v50 = vmul.f32 %v779_v47, %v773_v42  ;;  %vm440_vm5 = vweird.f32 %v779_v47 }
  0xa8   :  { %v142_v45 = vpop.f32.mrf.mxu2  ;;  %599 = vrcp.f32 %v223_v44  ;;  %v420_v52 = vmul.f32 %v781_v48, %v771_v40  ;;  %vm454_vm2 = vweird.f32 %v223_v44  ;;  %v458_v0 = vand.u32 2147483647, %v223_v44  ;;  %vm808_vm9 = vmor %vm439_vm4, %vm440_vm5 }
  0xa9   :  { %v143_v49 = vadd.f32 %v757_v18, %v142_v45  ;;  %v436_v54 = vsub.f32 1.0, %v435_v50  ;;  %v460_v1 = vand.u32 2147483648, %v223_v44  ;;  %vm425_vm11 = vweird.f32 %v781_v48 }
  0xaa   :  { %v421_v62 = vsub.f32 1.0, %v420_v52  ;;  %vm459_vm7 = vcmp.eq.f32.partialorder %v458_v0, 8.507059e+37  ;;  %vm827_vm13 = vmor %vm424_vm10, %vm425_vm11  ;;  %v431_v45 = vor.u32 1.1754944e-38, %v430_v31  ;;  %v188_v50 = vmul.f32 1.442695, %v166_v36 }
  0xab   :  { %v170_v53 = vsub.f32 0.0, %v143_v49  ;;  %v437_v5 = vmul.f32 %v779_v47, %v436_v54  ;;  %v461_v14 = vor.u32 1.1754944e-38, %v460_v1 }
  0xac   :  { %v422_v15 = vmul.f32 %v781_v48, %v421_v62  ;;  %v127_v39 = vpop.f32.mrf.mxu0 }
  0xad   :  { %v196_v63 = vmul.f32 1.442695, %v170_v53  ;;  %v438_v17 = vadd.f32 %v779_v47, %v437_v5  ;;  %v128_v40 = vadd.f32 %v757_v18, %v127_v39 }
  0xae   :  { %v600_v55 = vpop.eup %599  ;;  %v423_v34 = vadd.f32 %v781_v48, %v422_v15 }
  0xaf   :  { %v450_v61 = vmul.f32 %v600_v55, %v223_v44  ;;  %vm455_vm3 = vweird.f32 %v600_v55  ;;  %601 = vpow2.f32 %v196_v63  ;;  %v442_v33 = vsel %vm808_vm9, %v779_v47, %v438_v17 }
  0xb0   :  { %v145_v58 = vpop.f32.mrf.mxu2  ;;  %vm800_vm6 = vmor %vm454_vm2, %vm455_vm3  ;;  %v447_v44 = vsel %vm444_vm12, %v446_v29, %v442_v33  ;;  %v427_v21 = vsel %vm827_vm13, %v781_v48, %v423_v34  ;;  %v165_v56 = vsub.f32 0.0, %v128_v40 }
  0xb1   :  { %v146_v60 = vadd.f32 %v757_v18, %v145_v58  ;;  %v451_v4 = vsub.f32 1.0, %v450_v61  ;;  %v432_v52 = vsel %vm429_vm14, %v431_v45, %v427_v21  ;;  %v119_v61 = vadd.f32 %v757_v18, %v769_v38 }
  0xb2   :  { %v186_v63 = vmul.f32 1.442695, %v165_v56  ;;  %v163_v38 = vsub.f32 0.0, %v122_v59 }
  0xb3   :  { %v171_v3 = vsub.f32 0.0, %v146_v60  ;;  %v452_v10 = vmul.f32 %v600_v55, %v451_v4  ;;  %v116_v4 = vadd.f32 %v757_v18, %v766_v30  ;;  %v162_v5 = vsub.f32 0.0, %v119_v61 }
  0xb4   :  { %v182_v13 = vmul.f32 1.442695, %v163_v38 }
  0xb5   :  { %v198_v9 = vmul.f32 1.442695, %v171_v3  ;;  %v453_v16 = vadd.f32 %v600_v55, %v452_v10  ;;  %v602_v35 = vpop.eup %601  ;;  %v161_v22 = vsub.f32 0.0, %v116_v4 }
  0xb6   :  { %v833_v47 = vadd.f32 1.0, %v602_v35 }
  0xb7   :  { %603 = vpow2.f32 %v198_v9  ;;  %v457_v27 = vsel %vm800_vm6, %v600_v55, %v453_v16  ;;  %v125_v55 = vadd.f32 %v757_v18, %v792_v2  ;;  %v178_v24 = vmul.f32 1.442695, %v161_v22 }
  0xb8   :  { %v148_v20 = vpop.f32.mrf.mxu2  ;;  %605 = vpow2.f32 %v194_v12  ;;  %v462_v28 = vsel %vm459_vm7, %v461_v14, %v457_v27  ;;  %v160_v12 = vsub.f32 0.0, %v113_v46  ;;  %v180_v14 = vmul.f32 1.442695, %v162_v5 }
  0xb9   :  { %v149_v26 = vadd.f32 %v757_v18, %v148_v20  ;;  %565 = vmatpush.xpose.msk.msra.mxu1 %vm471_vm8, %v462_v28  ;;  %607 = vpow2.f32 %v190_v19  ;;  %v164_v62 = vsub.f32 0.0, %v125_v55  ;;  %vm379_vm9 = vweird.f32 %v833_v47 }
  0xba   :  { %609 = vpow2.f32 %v192_v25  ;;  %v176_v23 = vmul.f32 1.442695, %v160_v12 }
  0xbb   :  { %v172_v32 = vsub.f32 0.0, %v149_v26  ;;  %v184_v6 = vmul.f32 1.442695, %v164_v62 }
  0xbd   :  { %v604_v41 = vpop.eup %603  ;;  %v200_v42 = vmul.f32 1.442695, %v172_v32  ;;  %566 = vmatpush.xpose.msk.msra.mxu1 %vm471_vm8, %v447_v44 }
  0xbe   :  { %v831_v43 = vadd.f32 1.0, %v604_v41  ;;  %v606_v49 = vpop.eup %605 }
  0xbf   :  { %611 = vpow2.f32 %v200_v42  ;;  %v608_v51 = vpop.eup %607  ;;  %v841_v54 = vadd.f32 1.0, %v606_v49 }
  0xc0   :  { %613 = vrcp.f32 %v831_v43  ;;  %v610_v53 = vpop.eup %609  ;;  %v858_v1 = vadd.f32 1.0, %v608_v51  ;;  %v400_v39 = vand.u32 2147483648, %v831_v43  ;;  %vm394_vm4 = vweird.f32 %v831_v43 }
  0xc1   :  { %615 = vrcp.f32 %v833_v47  ;;  %567 = vmatpush.xpose.msk.msra.mxu1 %vm471_vm8, %v432_v52  ;;  %v849_v58 = vadd.f32 1.0, %v610_v53  ;;  %v398_v45 = vand.u32 2147483647, %v831_v43  ;;  %vm364_vm13 = vweird.f32 %v841_v54 }
  0xc2   :  { %617 = vpow2.f32 %v188_v50  ;;  %v401_v56 = vor.u32 1.1754944e-38, %v400_v39 }
  0xc3   :  { %619 = vrcp.f32 %v841_v54  ;;  %vm399_vm7 = vcmp.eq.f32.partialorder %v398_v45, 8.507059e+37 }
  0xc5   :  { %v612_v48 = vpop.eup %611 }
  0xc6   :  { %v847_v57 = vpop.eup %613  ;;  %v220_v60 = vadd.f32 1.0, %v612_v48  ;;  %v385_v48 = vand.u32 2147483648, %v833_v47 }
  0xc7   :  { %v856_v0 = vpop.eup %615  ;;  %v390_v2 = vmul.f32 %v847_v57, %v831_v43  ;;  %vm395_vm1 = vweird.f32 %v847_v57 }
  0xc8   :  { %621 = vrcp.f32 %v220_v60  ;;  %v618_v3 = vpop.eup %617  ;;  %v375_v7 = vmul.f32 %v856_v0, %v833_v47  ;;  %v415_v25 = vand.u32 2147483648, %v220_v60  ;;  %v413_v28 = vand.u32 2147483647, %v220_v60  ;;  %vm901_vm5 = vmor %vm394_vm4, %vm395_vm1 }
  0xc9   :  { %623 = vrcp.f32 %v849_v58  ;;  %v869_v8 = vpop.eup %619  ;;  %v871_v9 = vadd.f32 1.0, %v618_v3  ;;  %v391_v10 = vsub.f32 1.0, %v390_v2  ;;  %vm409_vm0 = vweird.f32 %v220_v60 }
  0xca   :  { %625 = vpow2.f32 %v186_v63  ;;  %v376_v15 = vsub.f32 1.0, %v375_v7  ;;  %v360_v16 = vmul.f32 %v869_v8, %v841_v54  ;;  %v416_v37 = vor.u32 1.1754944e-38, %v415_v25 }
  0xcb   :  { %627 = vrcp.f32 %v858_v1  ;;  %v392_v20 = vmul.f32 %v847_v57, %v391_v10  ;;  %vm414_vm3 = vcmp.eq.f32.partialorder %v413_v28, 8.507059e+37  ;;  %vm380_vm6 = vweird.f32 %v856_v0 }
  0xcc   :  { %629 = vpow2.f32 %v184_v6  ;;  %v377_v31 = vmul.f32 %v856_v0, %v376_v15  ;;  %v361_v32 = vsub.f32 1.0, %v360_v16  ;;  %vm918_vm10 = vmor %vm379_vm9, %vm380_vm6  ;;  %vm365_vm11 = vweird.f32 %v869_v8 }
  0xcd   :  { %631 = vrcp.f32 %v871_v9  ;;  %v393_v36 = vadd.f32 %v847_v57, %v392_v20  ;;  %v386_v5 = vor.u32 1.1754944e-38, %v385_v48  ;;  %v370_v6 = vand.u32 2147483648, %v841_v54  ;;  %vm939_vm14 = vmor %vm364_vm13, %vm365_vm11 }
  0xce   :  { %v622_v11 = vpop.eup %621  ;;  %633 = vpow2.f32 %v182_v13  ;;  %v378_v53 = vadd.f32 %v856_v0, %v377_v31  ;;  %v362_v55 = vmul.f32 %v869_v8, %v361_v32  ;;  %vm349_vm1 = vweird.f32 %v849_v58 }
  0xcf   :  { %v405_v18 = vmul.f32 %v622_v11, %v220_v60  ;;  %v874_v30 = vpop.eup %623  ;;  %635 = vpow2.f32 %v180_v14  ;;  %vm410_vm15 = vweird.f32 %v622_v11  ;;  %v397_v43 = vsel %vm901_vm5, %v847_v57, %v393_v36 }
  0xd0   :  { %v626_v17 = vpop.eup %625  ;;  %v345_v33 = vmul.f32 %v874_v30, %v849_v58  ;;  %637 = vpow2.f32 %v178_v24  ;;  %vm411_vm2 = vmor %vm409_vm0, %vm410_vm15  ;;  %v383_v60 = vand.u32 2147483647, %v833_v47  ;;  %v402_v57 = vsel %vm399_vm7, %v401_v56, %v397_v43 }
  0xd1   :  { %v406_v19 = vsub.f32 1.0, %v405_v18  ;;  %v880_v26 = vpop.eup %627  ;;  %v882_v29 = vadd.f32 1.0, %v626_v17  ;;  %v382_v3 = vsel %vm918_vm10, %v856_v0, %v378_v53  ;;  %v363_v47 = vadd.f32 %v869_v8, %v362_v55  ;;  %v465_v53 = vld [vmem:[%s1113_s4] sm:$0x7] }
  0xd2   :  { %v630_v34 = vpop.eup %629  ;;  %v330_v41 = vmul.f32 %v880_v26, %v858_v1  ;;  %v346_v51 = vsub.f32 1.0, %v345_v33  ;;  %vm384_vm12 = vcmp.eq.f32.partialorder %v383_v60, 8.507059e+37  ;;  %v368_v0 = vand.u32 2147483647, %v841_v54 }
  0xd3   :  { %v407_v27 = vmul.f32 %v622_v11, %v406_v19  ;;  %v892_v42 = vpop.eup %631  ;;  %v896_v40 = vadd.f32 1.0, %v630_v34  ;;  %639 = vrcp.f32 %v882_v29  ;;  %v387_v10 = vsel %vm384_vm12, %v386_v5, %v382_v3 }
  0xd4   :  { %v634_v21 = vpop.eup %633  ;;  %641 = vpow2.f32 %v176_v23  ;;  %v331_v63 = vsub.f32 1.0, %v330_v41  ;;  %v315_v2 = vmul.f32 %v892_v42, %v871_v9  ;;  %v347_v46 = vmul.f32 %v874_v30, %v346_v51 }
  0xd5   :  { %v408_v35 = vadd.f32 %v622_v11, %v407_v27  ;;  %v636_v52 = vpop.eup %635  ;;  %v913_v59 = vadd.f32 1.0, %v634_v21  ;;  %643 = vrcp.f32 %v896_v40  ;;  %vm350_vm15 = vweird.f32 %v874_v30 }
  0xd6   :  { %v638_v61 = vpop.eup %637  ;;  %v933_v38 = vadd.f32 1.0, %v636_v52  ;;  %v316_v12 = vsub.f32 1.0, %v315_v2  ;;  %v367_v22 = vsel %vm939_vm14, %v869_v8, %v363_v47  ;;  %v348_v13 = vadd.f32 %v874_v30, %v347_v46 }
  0xd7   :  { %v412_v44 = vsel %vm411_vm2, %v622_v11, %v408_v35  ;;  %645 = vrcp.f32 %v913_v59  ;;  %v332_v14 = vmul.f32 %v880_v26, %v331_v63  ;;  %v954_v15 = vadd.f32 1.0, %v638_v61  ;;  %vm964_vm2 = vmor %vm349_vm1, %vm350_vm15 }
  0xd8   :  { %v417_v49 = vsel %vm414_vm3, %v416_v37, %v412_v44  ;;  %647 = vrcp.f32 %v933_v38  ;;  %v371_v16 = vor.u32 1.1754944e-38, %v370_v6  ;;  %v355_v17 = vand.u32 2147483648, %v849_v58 }
  0xd9   :  { %568 = vmatpush.xpose.msk.msra.mxu1 %vm471_vm8, %v417_v49  ;;  %v931_v4 = vpop.eup %639  ;;  %vm369_vm0 = vcmp.eq.f32.partialorder %v368_v0, 8.507059e+37  ;;  %v353_v8 = vand.u32 2147483647, %v849_v58  ;;  %vm335_vm3 = vweird.f32 %v880_v26  ;;  %v317_v24 = vmul.f32 %v892_v42, %v316_v12 }
  0xda   :  { %v642_v7 = vpop.eup %641  ;;  %v300_v54 = vmul.f32 %v931_v4, %v882_v29  ;;  %v372_v20 = vsel %vm369_vm0, %v371_v16, %v367_v22  ;;  %v352_v58 = vsel %vm964_vm2, %v874_v30, %v348_v13  ;;  %v333_v27 = vadd.f32 %v880_v26, %v332_v14 }
  0xdb   :  { %v952_v18 = vpop.eup %643  ;;  %v960_v19 = vadd.f32 1.0, %v642_v7  ;;  %649 = vrcp.f32 %v954_v15  ;;  %v356_v32 = vor.u32 1.1754944e-38, %v355_v17  ;;  %v340_v33 = vand.u32 2147483648, %v858_v1 }
  0xdc   :  { %v301_v28 = vsub.f32 1.0, %v300_v54  ;;  %v285_v31 = vmul.f32 %v952_v18, %v896_v40  ;;  %vm354_vm4 = vcmp.eq.f32.partialorder %v353_v8, 8.507059e+37  ;;  %vm334_vm5 = vweird.f32 %v858_v1 }
  0xdd   :  { %569 = vmatpush.xpose.msk.msra.mxu1 %vm471_vm8, %v402_v57  ;;  %v970_v25 = vpop.eup %645  ;;  %v338_v34 = vand.u32 2147483647, %v858_v1  ;;  %651 = vrcp.f32 %v960_v19  ;;  %v357_v30 = vsel %vm354_vm4, %v356_v32, %v352_v58  ;;  %vm988_vm6 = vmor %vm334_vm5, %vm335_vm3  ;;  %vm320_vm7 = vweird.f32 %v892_v42 }
  0xde   :  { %v983_v35 = vpop.eup %647  ;;  %v270_v37 = vmul.f32 %v970_v25, %v913_v59  ;;  %v337_v1 = vsel %vm988_vm6, %v880_v26, %v333_v27  ;;  %v318_v39 = vadd.f32 %v892_v42, %v317_v24  ;;  %v302_v41 = vmul.f32 %v931_v4, %v301_v28 }
  0xdf   :  { %v286_v44 = vsub.f32 1.0, %v285_v31  ;;  %v341_v45 = vor.u32 1.1754944e-38, %v340_v33  ;;  %vm319_vm9 = vweird.f32 %v871_v9  ;;  %v323_v21 = vand.u32 2147483647, %v871_v9 }
  0xe0   :  { %v325_v49 = vand.u32 2147483648, %v871_v9  ;;  %vm339_vm10 = vcmp.eq.f32.partialorder %v338_v34, 8.507059e+37  ;;  %vm304_vm11 = vweird.f32 %v882_v29  ;;  %vm305_vm12 = vweird.f32 %v931_v4  ;;  %vm1012_vm13 = vmor %vm319_vm9, %vm320_vm7 }
  0xe1   :  { %570 = vmatpush.xpose.msk.msra.mxu1 %vm471_vm8, %v387_v10  ;;  %v255_v26 = vmul.f32 %v983_v35, %v933_v38  ;;  %v1008_v50 = vpop.eup %649  ;;  %v342_v51 = vsel %vm339_vm10, %v341_v45, %v337_v1  ;;  %v310_v43 = vand.u32 2147483648, %v882_v29  ;;  %v271_v9 = vsub.f32 1.0, %v270_v37  ;;  %vm1033_vm15 = vmor %vm304_vm11, %vm305_vm12 }
  0xe2   :  { %v322_v55 = vsel %vm1012_vm13, %v892_v42, %v318_v39  ;;  %v303_v56 = vadd.f32 %v931_v4, %v302_v41  ;;  %v308_v48 = vand.u32 2147483647, %v882_v29  ;;  %v287_v60 = vmul.f32 %v952_v18, %v286_v44 }
  0xe3   :  { %v653_v61 = vmov 0   ;;  %v1027_v57 = vpop.eup %651  ;;  %vm324_vm14 = vcmp.eq.f32.partialorder %v323_v21, 8.507059e+37  ;;  %v326_v62 = vor.u32 1.1754944e-38, %v325_v49  ;;  %vm289_vm0 = vweird.f32 %v896_v40  ;;  %v464_v21 = vld [vmem:[%s1114_s3] sm:$0x7] }
  0xe4   :  { %587 = vset.pattern.permute.xlu0 %v653_v61  ;;  %vm290_vm1 = vweird.f32 %v952_v18  ;;  %v256_v42 = vsub.f32 1.0, %v255_v26  ;;  %v240_v2 = vmul.f32 %v1008_v50, %v954_v15  ;;  %v311_v47 = vor.u32 1.1754944e-38, %v310_v43 }
  0xe5   :  { %571 = vmatpush.xpose.msk.msra.mxu1 %vm471_vm8, %v372_v20  ;;  %468 = vperm.xlu0 %587, %v465_v53   ;;  %v327_v3 = vsel %vm324_vm14, %v326_v62, %v322_v55  ;;  %v295_v46 = vand.u32 2147483648, %v896_v40  ;;  %v272_v5 = vmul.f32 %v970_v25, %v271_v9  ;;  %v307_v29 = vsel %vm1033_vm15, %v931_v4, %v303_v56  ;;  %vm1049_vm3 = vmor %vm289_vm0, %vm290_vm1 }
  0xe6   :  { %vm309_vm2 = vcmp.eq.f32.partialorder %v308_v48, 8.507059e+37  ;;  %v288_v6 = vadd.f32 %v952_v18, %v287_v60  ;;  %v293_v0 = vand.u32 2147483647, %v896_v40  ;;  %vm274_vm4 = vweird.f32 %v913_v59 }
  0xe7   :  { %vm275_vm5 = vweird.f32 %v970_v25  ;;  %v257_v10 = vmul.f32 %v983_v35, %v256_v42  ;;  %v241_v11 = vsub.f32 1.0, %v240_v2  ;;  %v312_v12 = vsel %vm309_vm2, %v311_v47, %v307_v29 }
  0xe8   :  { %v296_v22 = vor.u32 1.1754944e-38, %v295_v46  ;;  %v273_v4 = vadd.f32 %v970_v25, %v272_v5  ;;  %v280_v13 = vand.u32 2147483648, %v913_v59  ;;  %v292_v40 = vsel %vm1049_vm3, %v952_v18, %v288_v6  ;;  %vm1065_vm7 = vmor %vm274_vm4, %vm275_vm5 }
  0xe9   :  { %572 = vmatpush.xpose.msk.msra.mxu1 %vm471_vm8, %v357_v30  ;;  %vm294_vm6 = vcmp.eq.f32.partialorder %v293_v0, 8.507059e+37  ;;  %v278_v14 = vand.u32 2147483647, %v913_v59  ;;  %v225_v54 = vmul.f32 %v1027_v57, %v960_v19  ;;  %vm259_vm9 = vweird.f32 %v933_v38 }
  0xea   :  { %vm260_vm10 = vweird.f32 %v983_v35  ;;  %v265_v17 = vand.u32 2147483648, %v933_v38  ;;  %v297_v8 = vsel %vm294_vm6, %v296_v22, %v292_v40  ;;  %v281_v20 = vor.u32 1.1754944e-38, %v280_v13 }
  0xeb   :  { %v258_v18 = vadd.f32 %v983_v35, %v257_v10  ;;  %v263_v23 = vand.u32 2147483647, %v933_v38  ;;  %v277_v59 = vsel %vm1065_vm7, %v970_v25, %v273_v4  ;;  %vm279_vm11 = vcmp.eq.f32.partialorder %v278_v14, 8.507059e+37  ;;  %vm1078_vm12 = vmor %vm259_vm9, %vm260_vm10 }
  0xec   :  { %v242_v58 = vmul.f32 %v1008_v50, %v241_v11  ;;  %v226_v27 = vsub.f32 1.0, %v225_v54  ;;  %vm244_vm13 = vweird.f32 %v954_v15  ;;  %vm245_vm14 = vweird.f32 %v1008_v50 }
  0xed   :  { %573 = vmatpush.xpose.msk.msra.mxu1 %vm471_vm8, %v342_v51  ;;  %v282_v28 = vsel %vm279_vm11, %v281_v20, %v277_v59  ;;  %v262_v38 = vsel %vm1078_vm12, %v983_v35, %v258_v18  ;;  %v266_v31 = vor.u32 1.1754944e-38, %v265_v17  ;;  %v250_v25 = vand.u32 2147483648, %v954_v15  ;;  %vm246_vm0 = vmor %vm244_vm13, %vm245_vm14 }
  0xee   :  { %vm264_vm15 = vcmp.eq.f32.partialorder %v263_v23, 8.507059e+37  ;;  %v243_v32 = vadd.f32 %v1008_v50, %v242_v58  ;;  %v248_v33 = vand.u32 2147483647, %v954_v15  ;;  %v227_v34 = vmul.f32 %v1027_v57, %v226_v27 }
  0xef   :  { %vm229_vm1 = vweird.f32 %v960_v19  ;;  %vm230_vm2 = vweird.f32 %v1027_v57  ;;  %v267_v30 = vsel %vm264_vm15, %v266_v31, %v262_v38  ;;  %v251_v36 = vor.u32 1.1754944e-38, %v250_v25 }
  0xf0   :  { %v235_v35 = vand.u32 2147483648, %v960_v19  ;;  %v247_v37 = vsel %vm246_vm0, %v1008_v50, %v243_v32  ;;  %vm249_vm3 = vcmp.eq.f32.partialorder %v248_v33, 8.507059e+37  ;;  %v228_v1 = vadd.f32 %v1027_v57, %v227_v34  ;;  %vm231_vm4 = vmor %vm229_vm1, %vm230_vm2 }
  0xf1   :  { %574 = vmatpush.xpose.msk.msra.mxu1 %vm471_vm8, %v327_v3  ;;  %v233_v15 = vand.u32 2147483647, %v960_v19  ;;  %v252_v39 = vsel %vm249_vm3, %v251_v36, %v247_v37 }
  0xf2   :  { %v236_v41 = vor.u32 1.1754944e-38, %v235_v35  ;;  %v232_v44 = vsel %vm231_vm4, %v1027_v57, %v228_v1 }
  0xf3   :  { %vm234_vm5 = vcmp.eq.f32.partialorder %v233_v15, 8.507059e+37 }
  0xf4   :  { %v237_v45 = vsel %vm234_vm5, %v236_v41, %v232_v44 }
  0xf5   :  { %575 = vmatpush.xpose.msk.msra.mxu1 %vm471_vm8, %v312_v12 }
  0xf9   :  { %576 = vmatpush.xpose.msk.msra.mxu1 %vm471_vm8, %v297_v8 }
  0xfd   :  { %577 = vmatpush.xpose.msk.msra.mxu1 %vm471_vm8, %v282_v28 }
 0x101   :  { %578 = vmatpush.xpose.msk.msra.mxu1 %vm471_vm8, %v267_v30 }
 0x105   :  { %579 = vmatpush.xpose.msk.msra.mxu1 %vm471_vm8, %v252_v39 }
 0x109   :  { %580 = vmatpush.xpose.msk.msra.mxu1 %vm471_vm8, %v237_v45 }
 0x10c   :  { %581 = vmatmul.msk.f32.vlgmr.msra.gmra.mxu1 %vm471_vm8, %v464_v21 }
 0x157   :  { %v469_v49 = vpop.permute.xlu0 %468 }
 0x189   :  { %v540_v26 = vpop.f32.mrf.mxu1 }
 0x18a   :  { %v541_v19 = vadd.f32 %v540_v26, %v469_v49 }
 0x18c   :  { %543 = vst [vmem:[%s1115_s5] sm:$0x7] %v541_v19 }

</bundles_post_ra>
